<compile_context>
chip_gen: v7x
topology: tpu7x:2x2x1
jax: 0.10.0
libtpu: 0.0.40
codegen_flags: <defaults>
</compile_context>

<pallas_src>
import functools

import jax
import jax.numpy as jnp
from jax.experimental import pallas as pl
from jax.experimental.pallas import tpu as pltpu


def _round_up(x, m):
    return ((x + m - 1) // m) * m


def _ffn_kernel(x_ref, w1_ref, b1_ref, w2_ref, b2_ref, o_ref, acc_ref):
    # x_ref: (tm, dim_p)        w1_ref: (dim_p, th)   b1_ref: (1, th)
    # w2_ref: (th, dim_p)       b2_ref: (1, dim_p)
    # o_ref:  (tm, dim_p)       acc_ref: (tm, dim_p) f32 scratch
    h_idx = pl.program_id(1)

    @pl.when(h_idx == 0)
    def _init():
        acc_ref[...] = jnp.zeros_like(acc_ref)

    x = x_ref[...]

    # First linear (MXU), f32 accumulate, + bias for this hidden block.
    h = jnp.dot(x, w1_ref[...], preferred_element_type=jnp.float32) + b1_ref[...]

    # Exact (erf-based) GELU — matches torch.nn.GELU default.
    h = 0.5 * h * (1.0 + jax.lax.erf(h * jnp.float32(0.7071067811865476)))

    # Second linear (MXU): accumulate this hidden block's contribution.
    acc_ref[...] += jnp.dot(h.astype(x.dtype), w2_ref[...],
                            preferred_element_type=jnp.float32)

    @pl.when(h_idx == pl.num_programs(1) - 1)
    def _finalize():
        o_ref[...] = (acc_ref[...] + b2_ref[...]).astype(o_ref.dtype)


@functools.partial(jax.jit, static_argnames=("tm", "th"))
def feed_forward(x, w1, b1, w2, b2, *, tm=256, th=512):
    """x: [batch, seq, dim] -> [batch, seq, dim].

    w1: [dim, hidden], b1: [hidden], w2: [hidden, dim], b2: [dim].
    """
    batch, seq, dim = x.shape
    hidden = w1.shape[1]
    dtype = x.dtype

    # --- Tile sizing / padding (lane-dense: last dims multiples of 128) ----
    M = batch * seq
    tm_eff = min(tm, _round_up(M, 8))          # don't blow up tiny inputs
    M_p = _round_up(M, tm_eff)

    dim_p = _round_up(dim, 128)
    hid_p = _round_up(hidden, 128)
    th_eff = min(th, hid_p)                    # th is a multiple of 128
    hid_p = _round_up(hid_p, th_eff)

    # --- Zero-pad operands (zeros contribute nothing to the matmuls) -------
    x2d = jnp.zeros((M_p, dim_p), dtype).at[:M, :dim].set(x.reshape(M, dim))
    w1_p = jnp.zeros((dim_p, hid_p), w1.dtype).at[:dim, :hidden].set(w1)
    b1_p = jnp.zeros((1, hid_p), b1.dtype).at[0, :hidden].set(b1)
    w2_p = jnp.zeros((hid_p, dim_p), w2.dtype).at[:hidden, :dim].set(w2)
    b2_p = jnp.zeros((1, dim_p), b2.dtype).at[0, :dim].set(b2)

    grid = (M_p // tm_eff, hid_p // th_eff)

    # --- VMEM budget: 2x double-buffered tiles + f32 accumulator -----------
    itemsize = jnp.dtype(dtype).itemsize
    tile_elems = (tm_eff * dim_p          # x tile
                  + dim_p * th_eff + th_eff   # w1 block + b1 block
                  + th_eff * dim_p + dim_p    # w2 block + b2
                  + tm_eff * dim_p)       # out tile
    vmem_bytes = 2 * tile_elems * itemsize + tm_eff * dim_p * 4
    vmem_limit = int(min(max(1.3 * vmem_bytes, 32 << 20), 100 << 20))

    out2d = pl.pallas_call(
        _ffn_kernel,
        out_shape=jax.ShapeDtypeStruct((M_p, dim_p), dtype),
        grid_spec=pltpu.PrefetchScalarGridSpec(
            num_scalar_prefetch=0,
            grid=grid,
            in_specs=[
                pl.BlockSpec((tm_eff, dim_p), lambda i, h: (i, 0)),   # x rows
                pl.BlockSpec((dim_p, th_eff), lambda i, h: (0, h)),   # W1 cols
                pl.BlockSpec((1, th_eff), lambda i, h: (0, h)),       # b1 block
                pl.BlockSpec((th_eff, dim_p), lambda i, h: (h, 0)),   # W2 rows
                pl.BlockSpec((1, dim_p), lambda i, h: (0, 0)),        # b2
            ],
            out_specs=pl.BlockSpec((tm_eff, dim_p), lambda i, h: (i, 0)),
            scratch_shapes=[pltpu.VMEM((tm_eff, dim_p), jnp.float32)],
        ),
        compiler_params=pltpu.CompilerParams(
            dimension_semantics=("parallel", "arbitrary"),
            vmem_limit_bytes=vmem_limit,
        ),
    )(x2d, w1_p, b1_p, w2_p, b2_p)

    return out2d[:M, :dim].reshape(batch, seq, dim)


def _reference(x, w1, b1, w2, b2):
    hp = jax.lax.Precision.HIGHEST
    h = jnp.einsum("bsd,dh->bsh", x, w1, precision=hp) + b1
    h = jax.nn.gelu(h, approximate=False)
    return jnp.einsum("bsh,hd->bsd", h, w2, precision=hp) + b2


def _make_params(key, dim, hidden):
    k1, k2, k3, k4 = jax.random.split(key, 4)
    w1 = jax.random.uniform(k1, (dim, hidden), jnp.float32,
                            -1.0 / dim ** 0.5, 1.0 / dim ** 0.5)
    b1 = jax.random.uniform(k2, (hidden,), jnp.float32,
                            -1.0 / dim ** 0.5, 1.0 / dim ** 0.5)
    w2 = jax.random.uniform(k3, (hidden, dim), jnp.float32,
                            -1.0 / hidden ** 0.5, 1.0 / hidden ** 0.5)
    b2 = jax.random.uniform(k4, (dim,), jnp.float32,
                            -1.0 / hidden ** 0.5, 1.0 / hidden ** 0.5)
    return w1, b1, w2, b2


if __name__ == "__main__":
    key = jax.random.PRNGKey(0)

    # --- Test 1: original toy shapes (exercises dim/hidden padding) --------
    batch, seq, dim, hidden = 2, 8, 32, 64
    kx, kp = jax.random.split(key)
    x = jax.random.normal(kx, (batch, seq, dim), dtype=jnp.float32)
    w1, b1, w2, b2 = _make_params(kp, dim, hidden)

    out = feed_forward(x, w1, b1, w2, b2)
    jax.block_until_ready(out)
    ref = _reference(x, w1, b1, w2, b2)
    assert out.shape == x.shape
    assert jnp.allclose(out, ref, atol=1e-5, rtol=1e-5)

    # --- Test 2: lane-dense shapes, ragged M, multi-step hidden reduction --
    batch, seq, dim, hidden = 3, 5, 128, 256
    kx2, kp2 = jax.random.split(kp)
    x2 = jax.random.normal(kx2, (batch, seq, dim), dtype=jnp.float32)
    w1b, b1b, w2b, b2b = _make_params(kp2, dim, hidden)

    out2 = feed_forward(x2, w1b, b1b, w2b, b2b, th=128)   # 2 hidden steps
    jax.block_until_ready(out2)
    ref2 = _reference(x2, w1b, b1b, w2b, b2b)
    assert out2.shape == x2.shape
    assert jnp.allclose(out2, ref2, atol=1e-4, rtol=1e-4)

    print("KERNEL_OK")
</pallas_src>

<mosaic_0001>
module attributes {stable_mosaic.version = 11 : i64} {
  func.func @_ffn_kernel(%arg0: i32, %arg1: i32, %arg2: memref<16x128xf32, #tpu.memory_space<vmem>>, %arg3: memref<128x128xf32, #tpu.memory_space<vmem>>, %arg4: memref<1x128xf32, #tpu.memory_space<vmem>>, %arg5: memref<128x128xf32, #tpu.memory_space<vmem>>, %arg6: memref<1x128xf32, #tpu.memory_space<vmem>>, %arg7: memref<16x128xf32, #tpu.memory_space<vmem>>, %arg8: memref<16x128xf32, #tpu.memory_space<vmem>>) attributes {dimension_semantics = [#tpu.dimension_semantics<parallel>, #tpu.dimension_semantics<arbitrary>], iteration_bounds = array<i64: 1, 1>, scalar_prefetch = 0 : i64, scratch_operands = 1 : i64, tpu.core_type = #tpu.core_type<tc>, window_params = [{transform_indices = @transform_0, window_bounds = array<i64: 16, 128>}, {transform_indices = @transform_1, window_bounds = array<i64: 128, 128>}, {transform_indices = @transform_2, window_bounds = array<i64: 1, 128>}, {transform_indices = @transform_3, window_bounds = array<i64: 128, 128>}, {pipeline_mode = #tpu.pipeline_mode<synchronous>, transform_indices = @transform_4, window_bounds = array<i64: 1, 128>}, {transform_indices = @transform_5, window_bounds = array<i64: 16, 128>}]} {
    %c0_i32 = arith.constant 0 : i32
    %0 = arith.cmpi eq, %arg1, %c0_i32 : i32
    %1 = arith.extui %0 : i1 to i32
    %c0_i32_0 = arith.constant 0 : i32
    %2 = arith.cmpi ne, %1, %c0_i32_0 : i32
    scf.if %2 {
      %cst_18 = arith.constant 0.000000e+00 : f32
      %25 = vector.broadcast %cst_18 : f32 to vector<16x128xf32>
      %c0_19 = arith.constant 0 : index
      %c0_20 = arith.constant 0 : index
      %26 = vector.load %arg8[%c0_19, %c0_20] : memref<16x128xf32, #tpu.memory_space<vmem>>, vector<16x128xf32>
      tpu.vector_store %arg8[%c0_19, %c0_20], %25 {strides = array<i32>} : memref<16x128xf32, #tpu.memory_space<vmem>>, vector<16x128xf32>,
    } else {
    }
    %c0 = arith.constant 0 : index
    %c0_1 = arith.constant 0 : index
    %3 = vector.load %arg2[%c0, %c0_1] : memref<16x128xf32, #tpu.memory_space<vmem>>, vector<16x128xf32>
    %c0_2 = arith.constant 0 : index
    %c0_3 = arith.constant 0 : index
    %4 = vector.load %arg3[%c0_2, %c0_3] : memref<128x128xf32, #tpu.memory_space<vmem>>, vector<128x128xf32>
    %cst = arith.constant dense<0.000000e+00> : vector<16x128xf32>
    %5 = tpu.matmul %3, %4, %cst {dimension_numbers = #tpu.dot_dimension_numbers<[1], [0], [0], [1], [0, 0, 1, 1], [], []>} : vector<16x128xf32>, vector<128x128xf32>, vector<16x128xf32> -> vector<16x128xf32>
    %c0_4 = arith.constant 0 : index
    %c0_5 = arith.constant 0 : index
    %6 = vector.load %arg4[%c0_4, %c0_5] : memref<1x128xf32, #tpu.memory_space<vmem>>, vector<1x128xf32>
    %7 = vector.broadcast %6 : vector<1x128xf32> to vector<16x128xf32>
    %8 = arith.addf %5, %7 : vector<16x128xf32>
    %cst_6 = arith.constant 5.000000e-01 : f32
    %9 = vector.broadcast %cst_6 : f32 to vector<16x128xf32>
    %10 = arith.mulf %9, %8 : vector<16x128xf32>
    %cst_7 = arith.constant 0.707106769 : f32
    %11 = vector.broadcast %cst_7 : f32 to vector<16x128xf32>
    %12 = arith.mulf %8, %11 : vector<16x128xf32>
    %13 = math.erf %12 : vector<16x128xf32>
    %cst_8 = arith.constant 1.000000e+00 : f32
    %14 = vector.broadcast %cst_8 : f32 to vector<16x128xf32>
    %15 = arith.addf %14, %13 : vector<16x128xf32>
    %16 = arith.mulf %10, %15 : vector<16x128xf32>
    %c0_9 = arith.constant 0 : index
    %c0_10 = arith.constant 0 : index
    %17 = vector.load %arg8[%c0_9, %c0_10] : memref<16x128xf32, #tpu.memory_space<vmem>>, vector<16x128xf32>
    %c0_11 = arith.constant 0 : index
    %c0_12 = arith.constant 0 : index
    %18 = vector.load %arg5[%c0_11, %c0_12] : memref<128x128xf32, #tpu.memory_space<vmem>>, vector<128x128xf32>
    %cst_13 = arith.constant dense<0.000000e+00> : vector<16x128xf32>
    %19 = tpu.matmul %16, %18, %cst_13 {dimension_numbers = #tpu.dot_dimension_numbers<[1], [0], [0], [1], [0, 0, 1, 1], [], []>} : vector<16x128xf32>, vector<128x128xf32>, vector<16x128xf32> -> vector<16x128xf32>
    %20 = arith.addf %17, %19 : vector<16x128xf32>
    %c0_14 = arith.constant 0 : index
    %c0_15 = arith.constant 0 : index
    %21 = vector.load %arg8[%c0_14, %c0_15] : memref<16x128xf32, #tpu.memory_space<vmem>>, vector<16x128xf32>
    tpu.vector_store %arg8[%c0_14, %c0_15], %20 {strides = array<i32>} : memref<16x128xf32, #tpu.memory_space<vmem>>, vector<16x128xf32>,
    %c0_i32_16 = arith.constant 0 : i32
    %22 = arith.cmpi eq, %arg1, %c0_i32_16 : i32
    %23 = arith.extui %22 : i1 to i32
    %c0_i32_17 = arith.constant 0 : i32
    %24 = arith.cmpi ne, %23, %c0_i32_17 : i32
    scf.if %24 {
      %c0_18 = arith.constant 0 : index
      %c0_19 = arith.constant 0 : index
      %25 = vector.load %arg8[%c0_18, %c0_19] : memref<16x128xf32, #tpu.memory_space<vmem>>, vector<16x128xf32>
      %c0_20 = arith.constant 0 : index
      %c0_21 = arith.constant 0 : index
      %26 = vector.load %arg6[%c0_20, %c0_21] : memref<1x128xf32, #tpu.memory_space<vmem>>, vector<1x128xf32>
      %27 = vector.broadcast %26 : vector<1x128xf32> to vector<16x128xf32>
      %28 = arith.addf %25, %27 : vector<16x128xf32>
      %c0_22 = arith.constant 0 : index
      %c0_23 = arith.constant 0 : index
      %29 = vector.load %arg7[%c0_22, %c0_23] : memref<16x128xf32, #tpu.memory_space<vmem>>, vector<16x128xf32>
      tpu.vector_store %arg7[%c0_22, %c0_23], %28 {strides = array<i32>} : memref<16x128xf32, #tpu.memory_space<vmem>>, vector<16x128xf32>,
    } else {
    }
    return
  }
  func.func @transform_0(%arg0: i32, %arg1: i32) -> (i32, i32) {
    %c0_i32 = arith.constant 0 : i32
    %c0_i32_0 = arith.constant 0 : i32
    return %arg0, %c0_i32 : i32, i32
  }
  func.func @transform_1(%arg0: i32, %arg1: i32) -> (i32, i32) {
    %c0_i32 = arith.constant 0 : i32
    %c0_i32_0 = arith.constant 0 : i32
    return %c0_i32, %arg1 : i32, i32
  }
  func.func @transform_2(%arg0: i32, %arg1: i32) -> (i32, i32) {
    %c0_i32 = arith.constant 0 : i32
    %c0_i32_0 = arith.constant 0 : i32
    return %c0_i32, %arg1 : i32, i32
  }
  func.func @transform_3(%arg0: i32, %arg1: i32) -> (i32, i32) {
    %c0_i32 = arith.constant 0 : i32
    %c0_i32_0 = arith.constant 0 : i32
    return %arg1, %c0_i32 : i32, i32
  }
  func.func @transform_4(%arg0: i32, %arg1: i32) -> (i32, i32) {
    %c0_i32 = arith.constant 0 : i32
    %c0_i32_0 = arith.constant 0 : i32
    %c0_i32_1 = arith.constant 0 : i32
    return %c0_i32, %c0_i32_0 : i32, i32
  }
  func.func @transform_5(%arg0: i32, %arg1: i32) -> (i32, i32) {
    %c0_i32 = arith.constant 0 : i32
    %c0_i32_0 = arith.constant 0 : i32
    return %arg0, %c0_i32 : i32, i32
  }
}

</mosaic_0001>

<bundles_post_ra>
// kernel: feed_forward.1
= control target key start
LH: loop header
LB: loop body
LE: loop exit
PB: predicated region body
PF: predicated region fallthrough
CT: control target
= control target key end

     0   :  { %s573_s1 = inlined_call_operand.vmem [shape: f32[128,128], index: 1, kind: input, shape index: {}]   ;;  %s574_s0 = inlined_call_operand.vmem [shape: f32[16,128], index: 0, kind: input, shape index: {}]   ;;  %s575_s3 = inlined_call_operand.vmem [shape: f32[128,128], index: 3, kind: input, shape index: {}]   ;;  %s576_s2 = inlined_call_operand.vmem [shape: f32[1,128], index: 2, kind: input, shape index: {}]   ;;  %s577_s4 = inlined_call_operand.vmem [shape: f32[1,128], index: 4, kind: input, shape index: {}]   ;;  %s578_s5 = inlined_call_operand.vmem [shape: f32[16,128], index: 5, kind: output, shape index: {}]  }
   0x1   :  { %v28_v0 = vld [vmem:[%s573_s1] sm:$0xff]  ;;  %v29_v1 = vld [vmem:[%s573_s1 + $0x8] sm:$0xff]  ;;  %v30_v2 = vld [vmem:[%s573_s1 + $0x10] sm:$0xff] }
   0x2   :  { %v361_v3 = vpack.c.bf16 %v29_v1, %v28_v0  ;;  %v31_v4 = vld [vmem:[%s573_s1 + $0x18] sm:$0xff]  ;;  %v32_v6 = vld [vmem:[%s573_s1 + $0x20] sm:$0xff]  ;;  %v33_v7 = vld [vmem:[%s573_s1 + $0x28] sm:$0xff] }
   0x3   :  { %v365_v5 = vpack.c.bf16 %v31_v4, %v30_v2  ;;  %v369_v8 = vpack.c.bf16 %v33_v7, %v32_v6  ;;  %v34_v9 = vld [vmem:[%s573_s1 + $0x30] sm:$0xff]  ;;  %v35_v10 = vld [vmem:[%s573_s1 + $0x38] sm:$0xff]  ;;  %v26_v11 = vld [vmem:[%s574_s0] sm:$0xff] }
   0x4   :  { %362 = vmatprep.subr.bf16.mxu0 %v361_v3  ;;  %323 = vmatprep.mubr.f32.mxu0 %v26_v11  ;;  %v138_v12 = vld [vmem:[%s575_s3] sm:$0xff]  ;;  %v139_v13 = vld [vmem:[%s575_s3 + $0x8] sm:$0xff]  ;;  %v140_v14 = vld [vmem:[%s575_s3 + $0x10] sm:$0xff]  ;;  %v373_v20 = vpack.c.bf16 %v35_v10, %v34_v9 }
   0x5   :  { %364 = vmatpush3.bf16.msra.mxu0 %v361_v3  ;;  %v393_v15 = vpack.c.bf16 %v139_v13, %v138_v12  ;;  %v141_v16 = vld [vmem:[%s575_s3 + $0x18] sm:$0xff]  ;;  %v142_v18 = vld [vmem:[%s575_s3 + $0x20] sm:$0xff]  ;;  %v143_v19 = vld [vmem:[%s575_s3 + $0x28] sm:$0xff] }
   0x6   :  { %366 = vmatprep.subr.bf16.mxu0 %v365_v5  ;;  %v397_v17 = vpack.c.bf16 %v141_v16, %v140_v14  ;;  %v36_v21 = vld [vmem:[%s573_s1 + $0x40] sm:$0xff]  ;;  %v37_v22 = vld [vmem:[%s573_s1 + $0x48] sm:$0xff]  ;;  %v401_v23 = vpack.c.bf16 %v143_v19, %v142_v18  ;;  %v38_v25 = vld [vmem:[%s573_s1 + $0x50] sm:$0xff] }
   0x7   :  { %394 = vmatprep.subr.bf16.mxu1 %v393_v15  ;;  %v377_v24 = vpack.c.bf16 %v37_v22, %v36_v21  ;;  %v39_v26 = vld [vmem:[%s573_s1 + $0x58] sm:$0xff]  ;;  %v40_v28 = vld [vmem:[%s573_s1 + $0x60] sm:$0xff]  ;;  %v41_v29 = vld [vmem:[%s573_s1 + $0x68] sm:$0xff] }
   0x8   :  { %396 = vmatpush3.bf16.msra.mxu1 %v393_v15  ;;  %v381_v27 = vpack.c.bf16 %v39_v26, %v38_v25  ;;  %v385_v30 = vpack.c.bf16 %v41_v29, %v40_v28  ;;  %v42_v31 = vld [vmem:[%s573_s1 + $0x70] sm:$0xff]  ;;  %v43_v32 = vld [vmem:[%s573_s1 + $0x78] sm:$0xff]  ;;  %v27_v34 = vld [vmem:[%s574_s0 + $0x8] sm:$0xff] }
   0x9   :  { %368 = vmatpush3.bf16.msra.mxu0 %v365_v5  ;;  %398 = vmatprep.subr.bf16.mxu1 %v397_v17  ;;  %v389_v33 = vpack.c.bf16 %v43_v32, %v42_v31  ;;  %v144_v35 = vld [vmem:[%s575_s3 + $0x30] sm:$0xff]  ;;  %v145_v36 = vld [vmem:[%s575_s3 + $0x38] sm:$0xff]  ;;  %v146_v38 = vld [vmem:[%s575_s3 + $0x40] sm:$0xff] }
   0xa   :  { %370 = vmatprep.subr.bf16.mxu0 %v369_v8  ;;  %v405_v37 = vpack.c.bf16 %v145_v36, %v144_v35  ;;  %v147_v39 = vld [vmem:[%s575_s3 + $0x48] sm:$0xff]  ;;  %v148_v41 = vld [vmem:[%s575_s3 + $0x50] sm:$0xff]  ;;  %v149_v42 = vld [vmem:[%s575_s3 + $0x58] sm:$0xff] }
   0xb   :  { %v409_v40 = vpack.c.bf16 %v147_v39, %v146_v38  ;;  %v413_v43 = vpack.c.bf16 %v149_v42, %v148_v41  ;;  %v150_v44 = vld [vmem:[%s575_s3 + $0x60] sm:$0xff]  ;;  %v151_v45 = vld [vmem:[%s575_s3 + $0x68] sm:$0xff]  ;;  %v152_v47 = vld [vmem:[%s575_s3 + $0x70] sm:$0xff] }
   0xc   :  { %400 = vmatpush3.bf16.msra.mxu1 %v397_v17  ;;  %v417_v46 = vpack.c.bf16 %v151_v45, %v150_v44  ;;  %v153_v48 = vld [vmem:[%s575_s3 + $0x78] sm:$0xff]  ;;  %v253_v50 = vld [vmem:[%s576_s2] ss:$0 sm:$0xff] }
   0xd   :  { %372 = vmatpush3.bf16.msra.mxu0 %v369_v8  ;;  %402 = vmatprep.subr.bf16.mxu1 %v401_v23  ;;  %v421_v49 = vpack.c.bf16 %v153_v48, %v152_v47  ;;  %v254_v1 = vld [vmem:[%s577_s4] ss:$0 sm:$0xff] }
   0xe   :  { %374 = vmatprep.subr.bf16.mxu0 %v373_v20 }
  0x10   :  { %404 = vmatpush3.bf16.msra.mxu1 %v401_v23 }
  0x11   :  { %376 = vmatpush3.bf16.msra.mxu0 %v373_v20  ;;  %406 = vmatprep.subr.bf16.mxu1 %v405_v37 }
  0x12   :  { %378 = vmatprep.subr.bf16.mxu0 %v377_v24 }
  0x14   :  { %408 = vmatpush3.bf16.msra.mxu1 %v405_v37 }
  0x15   :  { %380 = vmatpush3.bf16.msra.mxu0 %v377_v24  ;;  %410 = vmatprep.subr.bf16.mxu1 %v409_v40 }
  0x16   :  { %382 = vmatprep.subr.bf16.mxu0 %v381_v27 }
  0x18   :  { %412 = vmatpush3.bf16.msra.mxu1 %v409_v40 }
  0x19   :  { %384 = vmatpush3.bf16.msra.mxu0 %v381_v27  ;;  %414 = vmatprep.subr.bf16.mxu1 %v413_v43 }
  0x1a   :  { %386 = vmatprep.subr.bf16.mxu0 %v385_v30 }
  0x1c   :  { %416 = vmatpush3.bf16.msra.mxu1 %v413_v43 }
  0x1d   :  { %388 = vmatpush3.bf16.msra.mxu0 %v385_v30  ;;  %418 = vmatprep.subr.bf16.mxu1 %v417_v46 }
  0x1e   :  { %390 = vmatprep.subr.bf16.mxu0 %v389_v33 }
  0x20   :  { %420 = vmatpush3.bf16.msra.mxu1 %v417_v46 }
  0x21   :  { %392 = vmatpush3.bf16.msra.mxu0 %v389_v33  ;;  %422 = vmatprep.subr.bf16.mxu1 %v421_v49 }
  0x24   :  { %324 = vmatmul.mubr.f32.vlgmr.msra.gmra.mrb[0].mxu0 %v27_v34  ;;  %424 = vmatpush3.bf16.msra.mxu1 %v421_v49 }
  0xf7   :  { %v325_v51 = vpop.f32.mrb[0].mxu0 }
  0xf8   :  { %v123_v52 = vadd.f32 %v325_v51, %v253_v50  ;;  %v117_v53 = vpop.f32.mrb[1].mxu0 }
  0xf9   :  { %v118_v54 = vadd.f32 %v253_v50, %v117_v53 }
  0xfa   :  { %v129_v55 = vmul.f32 0.70710677, %v123_v52  ;;  %v127_v62 = vmul.f32 0.5, %v123_v52 }
  0xfb   :  { %v128_v56 = vmul.f32 0.70710677, %v118_v54  ;;  %v126_v60 = vmul.f32 0.5, %v118_v54 }
  0xfc   :  { %425 = verf.f32 %v129_v55 }
  0xfd   :  { %427 = verf.f32 %v128_v56 }
 0x106   :  { %v426_v57 = vpop.eup %425 }
 0x107   :  { %v428_v58 = vpop.eup %427  ;;  %v133_v59 = vadd.f32 1.0, %v426_v57 }
 0x108   :  { %v132_v61 = vadd.f32 1.0, %v428_v58 }
 0x109   :  { %v135_v0 = vmul.f32 %v133_v59, %v127_v62 }
 0x10a   :  { %v134_v63 = vmul.f32 %v132_v61, %v126_v60 }
 0x10c   :  { %358 = vmatprep.mubr.f32.mxu1 %v134_v63 }
 0x10d   :  { %359 = vmatmul.mubr.f32.vlgmr.msra.gmra.mrb[0].mxu1 %v135_v0 }
 0x1e0   :  { %v360_v2 = vpop.f32.mrb[0].mxu1 }
 0x1e1   :  { %v246_v3 = vadd.f32 %v360_v2, %v254_v1  ;;  %v220_v4 = vpop.f32.mrb[1].mxu1 }
 0x1e2   :  { %v245_v5 = vadd.f32 %v254_v1, %v220_v4 }
 0x1e3   :  { %248 = vst [vmem:[%s578_s5 + $0x8] sm:$0xff] %v246_v3 }
 0x1e4   :  { %247 = vst [vmem:[%s578_s5] sm:$0xff] %v245_v5 }

</bundles_post_ra>
